<compile_context>
chip_gen: v6e
topology: v6e:2x2x1
jax: 0.10.0
libtpu: 0.0.40
codegen_flags: <defaults>
</compile_context>

<pallas_src>
import jax
import jax.numpy as jnp
from jax import lax
from jax.experimental import pallas as pl
from jax.experimental.pallas import tpu as pltpu


LANE = 128          # lane width / padded feature width of every slab
PARAM_ROWS = 144    # total sublane rows of the packed parameter slab

# Packed parameter slab layout (bf16, all unused entries are zero):
#   rows   0:8    W1   (content rows   0:4,  cols 0:25)   K=4   (x  -> 25)
#   rows   8:40   W2   (content rows   8:33, cols 0:50)   K=32  (25 -> 50)
#   rows  40:104  Whd  (content rows  40:90)              K=64  (50 -> heads)
#                        cols 0:2  = actor_lin1 weight
#                        cols 8:33 = l3 weight
#   rows 104:136  Wc   (content rows 104:129, col 2)      K=32  (25 -> 1)
#   rows 136:144  biases:
#     row 136: b1 (cols 0:25)
#     row 137: b2 (cols 0:50)
#     row 138: heads bias  (cols 0:2 = actor bias, cols 8:33 = l3 bias)
#     row 139: critic bias (col 2)
_W1_R, _W2_R, _WH_R, _WC_R, _B_R = 0, 8, 40, 104, 136
_ACTOR_C0, _L3_C0, _CRITIC_C = 0, 8, 2


def actor_critic_kernel(x_ref, p_ref, out_ref):
    x = x_ref[...]                                    # (G, 4) f32, one group

    # ---- F.normalize(x, dim=0): per-column L2 norm over the group rows ----
    eps = jnp.float32(1e-12)
    ss = jnp.sum(x * x, axis=0, keepdims=True)        # (1, 4) sublane reduce
    # rsqrt(max(ss, eps^2)) == 1 / max(sqrt(ss), eps); all-zero columns stay 0.
    xn = x * lax.rsqrt(jnp.maximum(ss, eps * eps))    # (G, 4)

    bias = p_ref[_B_R:_B_R + 8, :].astype(jnp.float32)   # (8, 128) bias rows

    # ---- y = relu(l1(x)) : 4-term VPU outer-product FMA (no MXU, no pad) ----
    w1 = p_ref[_W1_R:_W1_R + 4, :].astype(jnp.float32)   # (4, 128)
    y1 = (xn[:, 0:1] * w1[0:1, :] + xn[:, 1:2] * w1[1:2, :]
          + xn[:, 2:3] * w1[2:3, :] + xn[:, 3:4] * w1[3:4, :]) + bias[0:1, :]
    y1 = jnp.maximum(y1, 0.0)                         # (G, 128); cols 0:25 live

    # ---- y = relu(l2(y)) : (G,32)bf16 @ (32,128)bf16, f32 accumulate ----
    y2 = jnp.dot(y1[:, 0:32].astype(jnp.bfloat16), p_ref[_W2_R:_W2_R + 32, :],
                 preferred_element_type=jnp.float32) + bias[1:2, :]
    y2 = jnp.maximum(y2, 0.0)                         # cols 0:50 live, rest 0

    # ---- fused heads: actor_lin1 (lanes 0:2) + l3 (lanes 8:33) in one dot ----
    h = jnp.dot(y2[:, 0:64].astype(jnp.bfloat16), p_ref[_WH_R:_WH_R + 64, :],
                preferred_element_type=jnp.float32) + bias[2:3, :]

    # actor = log_softmax(actor_lin1(y), dim=0): column-wise over the group.
    # Computed on the whole slab (one vreg row-set); only lanes 0:2 are kept.
    h_max = jnp.max(h, axis=0, keepdims=True)
    h_shift = h - h_max
    lse = jnp.log(jnp.sum(jnp.exp(h_shift), axis=0, keepdims=True))
    logsm = h_shift - lse                             # (G, 128)

    # c = relu(l3(y.detach())) -> forward value only; l3 lives in lanes 8:33.
    c = jnp.maximum(h[:, _L3_C0:_L3_C0 + 32], 0.0)    # (G, 32); lanes 25:32 = 0

    # critic = tanh(critic_lin1(c)); weight column placement puts the critic
    # value directly in lane 2 of the output slab (other lanes tanh(0)=0).
    crit = jnp.tanh(jnp.dot(c.astype(jnp.bfloat16), p_ref[_WC_R:_WC_R + 32, :],
                            preferred_element_type=jnp.float32) + bias[3:4, :])

    # ---- single lane-dense store: lanes 0:2 actor log-probs, lane 2 critic ----
    lane = lax.broadcasted_iota(jnp.int32, h.shape, 1)
    out_ref[...] = jnp.where(lane < 2, logsm, crit)


def actor_critic_forward(x, packed_params, group_size=None):
    """x: (B, 4) f32, packed_params: (144, 128) bf16 slab.

    Each consecutive `group_size` rows form one INDEPENDENT batch of the
    PyTorch module: F.normalize / F.log_softmax (dim=0) act within a group.
    Returns (actor_logprobs (B, 2), critic (B, 1)).

    group_size=None processes the whole batch as a single group (identical to
    calling the PyTorch module once on x).  For rollout throughput, batch many
    env-state groups into one call; groups stream through the grid while the
    74-KiB parameter slab stays VMEM-resident.
    """
    B = x.shape[0]
    if group_size is None:
        group_size = B
    G = int(group_size)
    assert B % G == 0, "batch must be a multiple of group_size"
    num_groups = B // G
    if num_groups > 1:
        assert G % 8 == 0, "group_size must be a multiple of 8 when gridding"

    cost = pl.CostEstimate(
        flops=2 * B * LANE * (32 + 64 + 32) + 12 * B * LANE,
        transcendentals=2 * B * LANE + 2 * num_groups * LANE,
        bytes_accessed=4 * B * 4 + 4 * B * LANE + 2 * PARAM_ROWS * LANE,
    )

    out = pl.pallas_call(
        actor_critic_kernel,
        out_shape=jax.ShapeDtypeStruct((B, LANE), jnp.float32),
        grid=(num_groups,),
        in_specs=[
            pl.BlockSpec((G, 4), lambda g: (g, 0)),          # stream x groups
            pl.BlockSpec((PARAM_ROWS, LANE), lambda g: (0, 0)),  # resident slab
        ],
        out_specs=pl.BlockSpec((G, LANE), lambda g: (g, 0)),
        compiler_params=pltpu.CompilerParams(
            dimension_semantics=("parallel",),      # use both TCs on v7x
            vmem_limit_bytes=32 * 1024 * 1024,      # safe on v5e/v6e/v7x
        ),
        cost_estimate=cost,
    )(x, packed_params)

    actor = out[:, 0:2]
    critic = out[:, _CRITIC_C:_CRITIC_C + 1]
    return actor, critic


def init_params(key):
    """nn.Linear-style init: U(-1/sqrt(fan_in), 1/sqrt(fan_in)).

    Weights are stored transposed to (in_features, out_features); biases 1-D.
    """
    def linear(key, fan_in, fan_out):
        kw, kb = jax.random.split(key)
        bound = 1.0 / jnp.sqrt(jnp.float32(fan_in))
        w = jax.random.uniform(kw, (fan_in, fan_out), jnp.float32, -bound, bound)
        b = jax.random.uniform(kb, (fan_out,), jnp.float32, -bound, bound)
        return w, b

    k1, k2, k3, k4, k5 = jax.random.split(key, 5)
    w1, b1 = linear(k1, 4, 25)    # l1
    w2, b2 = linear(k2, 25, 50)   # l2
    wa, ba = linear(k3, 50, 2)    # actor_lin1
    w3, b3 = linear(k4, 50, 25)   # l3
    wc, bc = linear(k5, 25, 1)    # critic_lin1
    return dict(w1=w1, b1=b1, w2=w2, b2=b2, wa=wa, ba=ba,
                w3=w3, b3=b3, wc=wc, bc=bc)


def pack_params(p):
    """Pack all weights/biases into one zero-padded (144, 128) bf16 slab."""
    P = jnp.zeros((PARAM_ROWS, LANE), jnp.float32)
    P = P.at[_W1_R:_W1_R + 4, 0:25].set(p["w1"])
    P = P.at[_W2_R:_W2_R + 25, 0:50].set(p["w2"])
    P = P.at[_WH_R:_WH_R + 50, _ACTOR_C0:_ACTOR_C0 + 2].set(p["wa"])
    P = P.at[_WH_R:_WH_R + 50, _L3_C0:_L3_C0 + 25].set(p["w3"])
    P = P.at[_WC_R:_WC_R + 25, _CRITIC_C:_CRITIC_C + 1].set(p["wc"])
    P = P.at[_B_R + 0, 0:25].set(p["b1"])
    P = P.at[_B_R + 1, 0:50].set(p["b2"])
    P = P.at[_B_R + 2, _ACTOR_C0:_ACTOR_C0 + 2].set(p["ba"])
    P = P.at[_B_R + 2, _L3_C0:_L3_C0 + 25].set(p["b3"])
    P = P.at[_B_R + 3, _CRITIC_C].set(p["bc"][0])
    return P.astype(jnp.bfloat16)                     # bf16-native MXU operands


def reference_forward(x, p):
    """Plain-JAX f32 replica of the PyTorch forward for one group."""
    eps = 1e-12
    xn = x / jnp.maximum(jnp.sqrt(jnp.sum(x * x, axis=0, keepdims=True)), eps)
    y = jax.nn.relu(xn @ p["w1"] + p["b1"])
    y = jax.nn.relu(y @ p["w2"] + p["b2"])
    actor = jax.nn.log_softmax(y @ p["wa"] + p["ba"], axis=0)
    c = jax.nn.relu(y @ p["w3"] + p["b3"])
    critic = jnp.tanh(c @ p["wc"] + p["bc"])
    return actor, critic


if __name__ == "__main__":
    key = jax.random.PRNGKey(0)
    k_x, k_p = jax.random.split(key)

    # 4 independent groups of 16 CartPole states (4 features each).
    NUM_GROUPS, GROUP = 4, 16
    B = NUM_GROUPS * GROUP
    x = jax.random.normal(k_x, (B, 4), dtype=jnp.float32)
    params = init_params(k_p)
    packed = pack_params(params)

    fwd = jax.jit(actor_critic_forward, static_argnames=("group_size",))
    actor, critic = fwd(x, packed, group_size=GROUP)
    actor = jax.block_until_ready(actor)
    critic = jax.block_until_ready(critic)

    # Reference: apply the module independently to each group (f32).
    xg = x.reshape(NUM_GROUPS, GROUP, 4)
    ref_a, ref_c = jax.vmap(lambda xx: reference_forward(xx, params))(xg)
    ref_a = ref_a.reshape(B, 2)
    ref_c = ref_c.reshape(B, 1)

    assert actor.shape == (B, 2) and critic.shape == (B, 1)
    # bf16 MXU operands => loosened tolerance vs. the f32 reference.
    assert jnp.allclose(actor, ref_a, atol=3e-2, rtol=3e-2), (
        jnp.max(jnp.abs(actor - ref_a)))
    assert jnp.allclose(critic, ref_c, atol=3e-2, rtol=3e-2), (
        jnp.max(jnp.abs(critic - ref_c)))

    print("KERNEL_OK")
</pallas_src>

<mosaic_0001>
module attributes {stable_mosaic.version = 11 : i64} {
  func.func @actor_critic_kernel(%arg0: i32, %arg1: memref<16x4xf32, #tpu.memory_space<vmem>>, %arg2: memref<144x128xbf16, #tpu.memory_space<vmem>>, %arg3: memref<16x128xf32, #tpu.memory_space<vmem>>) attributes {dimension_semantics = [#tpu.dimension_semantics<parallel>], iteration_bounds = array<i64: 4>, scalar_prefetch = 0 : i64, scratch_operands = 0 : i64, tpu.core_type = #tpu.core_type<tc>, window_params = [{transform_indices = @transform_0, window_bounds = array<i64: 16, 4>}, {pipeline_mode = #tpu.pipeline_mode<synchronous>, transform_indices = @transform_1, window_bounds = array<i64: 144, 128>}, {transform_indices = @transform_2, window_bounds = array<i64: 16, 128>}]} {
    %c0 = arith.constant 0 : index
    %c0_0 = arith.constant 0 : index
    %0 = vector.load %arg1[%c0, %c0_0] : memref<16x4xf32, #tpu.memory_space<vmem>>, vector<16x4xf32>
    %1 = arith.mulf %0, %0 : vector<16x4xf32>
    %cst = arith.constant dense<0.000000e+00> : vector<4xf32>
    %2 = vector.multi_reduction <add>, %1, %cst [0] : vector<16x4xf32> to vector<4xf32>
    %3 = vector.shape_cast %2 : vector<4xf32> to vector<1x4xf32>
    %cst_1 = arith.constant 9.99999996E-13 : f32
    %cst_2 = arith.constant 9.99999996E-13 : f32
    %4 = arith.mulf %cst_1, %cst_2 : f32
    %5 = vector.broadcast %4 : f32 to vector<1x4xf32>
    %6 = arith.maximumf %3, %5 : vector<1x4xf32>
    %7 = math.rsqrt %6 : vector<1x4xf32>
    %8 = vector.broadcast %7 : vector<1x4xf32> to vector<16x4xf32>
    %9 = arith.mulf %0, %8 : vector<16x4xf32>
    %c136 = arith.constant 136 : index
    %c0_3 = arith.constant 0 : index
    %10 = vector.load %arg2[%c136, %c0_3] : memref<144x128xbf16, #tpu.memory_space<vmem>>, vector<8x128xbf16>
    %11 = arith.extf %10 : vector<8x128xbf16> to vector<8x128xf32>
    %c0_4 = arith.constant 0 : index
    %c0_5 = arith.constant 0 : index
    %12 = vector.load %arg2[%c0_4, %c0_5] : memref<144x128xbf16, #tpu.memory_space<vmem>>, vector<4x128xbf16>
    %13 = arith.extf %12 : vector<4x128xbf16> to vector<4x128xf32>
    %14 = vector.extract_strided_slice %9 {offsets = [0, 0], sizes = [16, 1], strides = [1, 1]} : vector<16x4xf32> to vector<16x1xf32>
    %15 = vector.extract_strided_slice %13 {offsets = [0, 0], sizes = [1, 128], strides = [1, 1]} : vector<4x128xf32> to vector<1x128xf32>
    %16 = vector.broadcast %14 : vector<16x1xf32> to vector<16x128xf32>
    %17 = vector.broadcast %15 : vector<1x128xf32> to vector<16x128xf32>
    %18 = arith.mulf %16, %17 : vector<16x128xf32>
    %19 = vector.extract_strided_slice %9 {offsets = [0, 1], sizes = [16, 1], strides = [1, 1]} : vector<16x4xf32> to vector<16x1xf32>
    %20 = vector.extract_strided_slice %13 {offsets = [1, 0], sizes = [1, 128], strides = [1, 1]} : vector<4x128xf32> to vector<1x128xf32>
    %21 = vector.broadcast %19 : vector<16x1xf32> to vector<16x128xf32>
    %22 = vector.broadcast %20 : vector<1x128xf32> to vector<16x128xf32>
    %23 = arith.mulf %21, %22 : vector<16x128xf32>
    %24 = arith.addf %18, %23 : vector<16x128xf32>
    %25 = vector.extract_strided_slice %9 {offsets = [0, 2], sizes = [16, 1], strides = [1, 1]} : vector<16x4xf32> to vector<16x1xf32>
    %26 = vector.extract_strided_slice %13 {offsets = [2, 0], sizes = [1, 128], strides = [1, 1]} : vector<4x128xf32> to vector<1x128xf32>
    %27 = vector.broadcast %25 : vector<16x1xf32> to vector<16x128xf32>
    %28 = vector.broadcast %26 : vector<1x128xf32> to vector<16x128xf32>
    %29 = arith.mulf %27, %28 : vector<16x128xf32>
    %30 = arith.addf %24, %29 : vector<16x128xf32>
    %31 = vector.extract_strided_slice %9 {offsets = [0, 3], sizes = [16, 1], strides = [1, 1]} : vector<16x4xf32> to vector<16x1xf32>
    %32 = vector.extract_strided_slice %13 {offsets = [3, 0], sizes = [1, 128], strides = [1, 1]} : vector<4x128xf32> to vector<1x128xf32>
    %33 = vector.broadcast %31 : vector<16x1xf32> to vector<16x128xf32>
    %34 = vector.broadcast %32 : vector<1x128xf32> to vector<16x128xf32>
    %35 = arith.mulf %33, %34 : vector<16x128xf32>
    %36 = arith.addf %30, %35 : vector<16x128xf32>
    %37 = vector.extract_strided_slice %11 {offsets = [0, 0], sizes = [1, 128], strides = [1, 1]} : vector<8x128xf32> to vector<1x128xf32>
    %38 = vector.broadcast %37 : vector<1x128xf32> to vector<16x128xf32>
    %39 = arith.addf %36, %38 : vector<16x128xf32>
    %cst_6 = arith.constant 0.000000e+00 : f32
    %40 = vector.broadcast %cst_6 : f32 to vector<16x128xf32>
    %41 = arith.maximumf %39, %40 : vector<16x128xf32>
    %42 = vector.extract_strided_slice %41 {offsets = [0, 0], sizes = [16, 32], strides = [1, 1]} : vector<16x128xf32> to vector<16x32xf32>
    %43 = arith.truncf %42 : vector<16x32xf32> to vector<16x32xbf16>
    %c8 = arith.constant 8 : index
    %c0_7 = arith.constant 0 : index
    %44 = vector.load %arg2[%c8, %c0_7] : memref<144x128xbf16, #tpu.memory_space<vmem>>, vector<32x128xbf16>
    %cst_8 = arith.constant dense<0.000000e+00> : vector<16x128xf32>
    %45 = tpu.matmul %43, %44, %cst_8 {dimension_numbers = #tpu.dot_dimension_numbers<[1], [0], [0], [1], [0, 0, 1, 1], [], []>} : vector<16x32xbf16>, vector<32x128xbf16>, vector<16x128xf32> -> vector<16x128xf32>
    %46 = vector.extract_strided_slice %11 {offsets = [1, 0], sizes = [1, 128], strides = [1, 1]} : vector<8x128xf32> to vector<1x128xf32>
    %47 = vector.broadcast %46 : vector<1x128xf32> to vector<16x128xf32>
    %48 = arith.addf %45, %47 : vector<16x128xf32>
    %cst_9 = arith.constant 0.000000e+00 : f32
    %49 = vector.broadcast %cst_9 : f32 to vector<16x128xf32>
    %50 = arith.maximumf %48, %49 : vector<16x128xf32>
    %51 = vector.extract_strided_slice %50 {offsets = [0, 0], sizes = [16, 64], strides = [1, 1]} : vector<16x128xf32> to vector<16x64xf32>
    %52 = arith.truncf %51 : vector<16x64xf32> to vector<16x64xbf16>
    %c40 = arith.constant 40 : index
    %c0_10 = arith.constant 0 : index
    %53 = vector.load %arg2[%c40, %c0_10] : memref<144x128xbf16, #tpu.memory_space<vmem>>, vector<64x128xbf16>
    %cst_11 = arith.constant dense<0.000000e+00> : vector<16x128xf32>
    %54 = tpu.matmul %52, %53, %cst_11 {dimension_numbers = #tpu.dot_dimension_numbers<[1], [0], [0], [1], [0, 0, 1, 1], [], []>} : vector<16x64xbf16>, vector<64x128xbf16>, vector<16x128xf32> -> vector<16x128xf32>
    %55 = vector.extract_strided_slice %11 {offsets = [2, 0], sizes = [1, 128], strides = [1, 1]} : vector<8x128xf32> to vector<1x128xf32>
    %56 = vector.broadcast %55 : vector<1x128xf32> to vector<16x128xf32>
    %57 = arith.addf %54, %56 : vector<16x128xf32>
    %cst_12 = arith.constant dense<0xFF800000> : vector<128xf32>
    %58 = vector.multi_reduction <maximumf>, %57, %cst_12 [0] : vector<16x128xf32> to vector<128xf32>
    %59 = vector.shape_cast %58 : vector<128xf32> to vector<1x128xf32>
    %60 = vector.broadcast %59 : vector<1x128xf32> to vector<16x128xf32>
    %61 = arith.subf %57, %60 : vector<16x128xf32>
    %62 = math.exp %61 : vector<16x128xf32>
    %cst_13 = arith.constant dense<0.000000e+00> : vector<128xf32>
    %63 = vector.multi_reduction <add>, %62, %cst_13 [0] : vector<16x128xf32> to vector<128xf32>
    %64 = vector.shape_cast %63 : vector<128xf32> to vector<1x128xf32>
    %65 = math.log %64 : vector<1x128xf32>
    %66 = vector.broadcast %65 : vector<1x128xf32> to vector<16x128xf32>
    %67 = arith.subf %61, %66 : vector<16x128xf32>
    %68 = vector.extract_strided_slice %57 {offsets = [0, 8], sizes = [16, 32], strides = [1, 1]} : vector<16x128xf32> to vector<16x32xf32>
    %cst_14 = arith.constant 0.000000e+00 : f32
    %69 = vector.broadcast %cst_14 : f32 to vector<16x32xf32>
    %70 = arith.maximumf %68, %69 : vector<16x32xf32>
    %71 = arith.truncf %70 : vector<16x32xf32> to vector<16x32xbf16>
    %c104 = arith.constant 104 : index
    %c0_15 = arith.constant 0 : index
    %72 = vector.load %arg2[%c104, %c0_15] : memref<144x128xbf16, #tpu.memory_space<vmem>>, vector<32x128xbf16>
    %cst_16 = arith.constant dense<0.000000e+00> : vector<16x128xf32>
    %73 = tpu.matmul %71, %72, %cst_16 {dimension_numbers = #tpu.dot_dimension_numbers<[1], [0], [0], [1], [0, 0, 1, 1], [], []>} : vector<16x32xbf16>, vector<32x128xbf16>, vector<16x128xf32> -> vector<16x128xf32>
    %74 = vector.extract_strided_slice %11 {offsets = [3, 0], sizes = [1, 128], strides = [1, 1]} : vector<8x128xf32> to vector<1x128xf32>
    %75 = vector.broadcast %74 : vector<1x128xf32> to vector<16x128xf32>
    %76 = arith.addf %73, %75 : vector<16x128xf32>
    %77 = math.tanh %76 : vector<16x128xf32>
    %78 = tpu.iota {dimensions = array<i32: 1>} : vector<16x128xi32>
    %c2_i32 = arith.constant 2 : i32
    %79 = vector.broadcast %c2_i32 : i32 to vector<16x128xi32>
    %80 = arith.cmpi slt, %78, %79 : vector<16x128xi32>
    %81 = arith.select %80, %67, %77 : vector<16x128xi1>, vector<16x128xf32>
    %c0_17 = arith.constant 0 : index
    %c0_18 = arith.constant 0 : index
    %82 = vector.load %arg3[%c0_17, %c0_18] : memref<16x128xf32, #tpu.memory_space<vmem>>, vector<16x128xf32>
    tpu.vector_store %arg3[%c0_17, %c0_18], %81 {strides = array<i32>} : memref<16x128xf32, #tpu.memory_space<vmem>>, vector<16x128xf32>,
    return
  }
  func.func @transform_0(%arg0: i32) -> (i32, i32) {
    %c0_i32 = arith.constant 0 : i32
    %c0_i32_0 = arith.constant 0 : i32
    return %arg0, %c0_i32 : i32, i32
  }
  func.func @transform_1(%arg0: i32) -> (i32, i32) {
    %c0_i32 = arith.constant 0 : i32
    %c0_i32_0 = arith.constant 0 : i32
    %c0_i32_1 = arith.constant 0 : i32
    return %c0_i32, %c0_i32_0 : i32, i32
  }
  func.func @transform_2(%arg0: i32) -> (i32, i32) {
    %c0_i32 = arith.constant 0 : i32
    %c0_i32_0 = arith.constant 0 : i32
    return %arg0, %c0_i32 : i32, i32
  }
}

</mosaic_0001>

<bundles_post_ra>
// kernel: actor_critic_forward.1
= control target key start
LH: loop header
LB: loop body
LE: loop exit
PB: predicated region body
PF: predicated region fallthrough
CT: control target
= control target key end

     0   :  { %7 = vsyncpa [#allocation3], 0  ;;  %s758_s9 = smov 0   ;;  %s837_s0 = inlined_call_operand.vmem [shape: f32[64,4], index: 0, kind: input, shape index: {}]   ;;  %s838_s1 = inlined_call_operand.hbm [shape: bf16[144,128], index: 1, kind: input, shape index: {}]   ;;  %s839_s2 = inlined_call_operand.vmem [shape: f32[64,128], index: 2, kind: output, shape index: {}]  }
   0x1 LB: > { %s578_s10 = sadd.s32 4294967295, %s731_s9   ;;  %p580_p0 = scmp.ge.s32.totalorder %s731_s9, 1  ;;  %s731_s9 = sphi %s758_s9, %s13_s9  }
   0x2   : > { %p91_p1 = scmp.lt.s32.totalorder %s731_s9, 5  ;;  %s733_s11 = smov [#allocation2]  }
   0x3   : > { %s103_s12 = sshll.u32 %s733_s11, 4  ;;  %p770_p3 = scmp.eq.s32.totalorder %s578_s10, 0  ;;  %s104_s12 = int_to_ptr.vmem [resolvable:$true] %s103_s12 }
   0x4   : > { %p766_p2 = pnand %p580_p0, %p91_p1  ;;  %s706_s15 = scalar_lea.vmem %s104_s12, 1152 }
   0x5   : > { %p707_p7 = scmp.ne.s32.totalorder %s104_s12, %s706_s15  ;;  %p714_p10 = scmp.lt.s32.totalorder %s104_s12, %s104_s12 }
   0x6   : > { %p645_p4 = pneg %p766_p2  ;;  %p715_p11 = scmp.lt.s32.totalorder %s706_s15, %s706_s15 }
   0x8   : > { %p646_p5 = pnand %p770_p3, %p645_p4  ;;  %p716_p12 = por %p715_p11, %p714_p10 }
   0xa   : > { %p697_p6 = pneg %p646_p5 }
   0xc   : > { %p709_p8 = pnand %p707_p7, %p697_p6 }
   0xe   : > { %p710_p9 = pneg %p709_p8 }
  0x10   : > { %p717_p13 = pnand %p716_p12, %p710_p9 }
  0x12   : > { %720 = shalt.err (!%p717_p13)
}
  0x13   : > { %s734_s16 = smov 64   ;;  %s735_s17 = smov 4  }
  0x14   : > { %648 = dma.hbm_to_vmem [thread:$0]  (!%p646_p5), %s838_s1, 1152, %s104_s12, [#allocation3], %s734_s16, %s734_s16, %s735_s17  }
  0x15   : > { %128 = sbr.rel (%p766_p2) target bundleno = 953 (0x3b9), region = 28 }
  0x1a   : > { %726 = dma.done.wait (%p770_p3), [#allocation3], 1152  }
  0x1b   : > { %728 = vsyncadd (%p770_p3), [#allocation3], 4294966144  ;;  %s585_s20 = sshll.u32 %s578_s10, 1  ;;  %v736_v0 = vmov 1   ;;  %v737_v1 = vmov 0   ;;  %vm167_vm0 = vcmask 31744   ;;  %v195_v25 = vlaneseq }
  0x1c   : > { %670 = vset.pattern.permute.xlu1 %v736_v0  ;;  %669 = vset.pattern.permute.xlu0 %v737_v1  ;;  %p151_p0 = scmp.lt.s32.totalorder %s585_s20, 7  ;;  %v738_v19 = vmov 2   ;;  %v675_v20 = vld [vmem:[#allocation2 + $0xc] sm:$0xff]   ;;  %v739_v21 = vmov 0.0   ;;  %v740_v22 = vmov 3   ;;  %v676_v23 = vld [vmem:[#allocation2 + $0x4] sm:$0xff]  }
  0x1d   : > { %613 = vmatprep.subr.bf16.mxu0 %v739_v21  ;;  %621 = vmatprep.subr.bf16.mxu1 %v739_v21  ;;  %vm741_vm1 = vmmov 0   ;;  %v677_v24 = vld [vmem:[#allocation2 + $0x2c] sm:$0xff]   ;;  %v805_v26 = vshrl.u32 %v195_v25, 7  ;;  %v183_v27 = vld [vmem:[#allocation2] sm:$0x3]  ;;  %vm278_vm2 = vcmask 261120  }
  0x1e   : > { %s843_s20 = smov (!%p151_p0, %s585_s20), 7  ;;  %614 = vmatpush3.bf16.msra.mxu0 %v675_v20  ;;  %617 = vmatprep.mubr.msk.bf16.mxu0 %vm741_vm1, %v739_v21  ;;  %v184_v30 = vunpack.c.l.bf16 %v183_v27  ;;  %v181_v39 = vld [vmem:[#allocation2 + $0x44] sm:$0xf]  ;;  %vm362_vm3 = vcmask 523264   ;;  %s742_s25 = smov 120  }
  0x1f   : > { %s586_s21 = sshll.u32 %s843_s20, 3  ;;  %615 = vmatprep.subr.bf16.mxu0 %v739_v21  ;;  %629 = vmatprep.mubr.msk.bf16.mxu1 %vm741_vm1, %v739_v21  ;;  %v211_v31 = vsub.s32 1, %v805_v26  ;;  %v197_v32 = vsub.s32 0, %v805_v26  ;;  %v227_v33 = vsub.s32 2, %v805_v26  ;;  %v243_v40 = vsub.s32 3, %v805_v26 }
  0x20   : > { %s154_s24 = scalar_lea.vmem %s837_s0, %s586_s21  ;;  %622 = vmatpush3.bf16.msra.mxu1 %v677_v24  ;;  %v811_v47 = vunpack.c.l.bf16 %v181_v39  ;;  %s160_s28 = scalar_lea.vmem %s839_s2, %s586_s21 }
  0x21   : > { %v163_v2 = vld [vmem:[%s154_s24] sm:$0xff]  ;;  %v164_v3 = vld [vmem:[%s154_s24 + $0x8] sm:$0xff]  ;;  %623 = vmatprep.subr.bf16.mxu1 %v739_v21  ;;  %v212_v36 = vrot.slane %v184_v30, %v211_v31  ;;  %v198_v37 = vrot.slane %v184_v30, %v197_v32  ;;  %v228_v38 = vrot.slane %v184_v30, %v227_v33  ;;  %v244_v50 = vrot.slane %v184_v30, %v243_v40 }
  0x22   : > { %v165_v4 = vmul.f32 %v163_v2, %v163_v2  ;;  %v166_v5 = vmul.f32 %v164_v3, %v164_v3  ;;  %616 = vmatpush3.bf16.msra.mxu0 %v676_v23  ;;  %v252_v53 = vrot.slane %v811_v47, %v197_v32 }
  0x23   : > { %633 = vmatprep.subr.bf16.mxu0 %v739_v21 }
  0x24   : > { %v168_v6 = vsel %vm167_vm0, %v165_v4, 0.0  ;;  %v169_v7 = vsel %vm167_vm0, %v166_v5, 0.0  ;;  %v679_v4 = vld [vmem:[#allocation2 + $0x1c] sm:$0xff]   ;;  %v680_v5 = vld [vmem:[#allocation2 + $0x14] sm:$0xff]  }
  0x25   : > { %v170_v8 = vadd.f32 %v169_v7, %v168_v6  ;;  %v265_v6 = vrot.slane %v811_v47, %v211_v31 }
  0x27   : > { %v171_v9 = vrot.slane %v170_v8, 4 }
  0x29   : > { %v172_v10 = vadd.f32 %v171_v9, %v170_v8 }
  0x2b   : > { %v173_v11 = vrot.slane %v172_v10, 2 }
  0x2d   : > { %v174_v12 = vadd.f32 %v173_v11, %v172_v10 }
  0x2f   : > { %v175_v13 = vrot.slane %v174_v12, 1 }
  0x31   : > { %v176_v14 = vadd.f32 %v175_v13, %v174_v12 }
  0x33   : > { %v177_v15 = vmax.f32 %v176_v14, 1e-24 }
  0x35   : > { %683 = vrsqrt.f32 %v177_v15 }
  0x42   : > { %v684_v16 = vpop.eup %683 }
  0x43   : > { %v179_v17 = vmul.f32 %v684_v16, %v163_v2  ;;  %v180_v18 = vmul.f32 %v684_v16, %v164_v3  ;;  %v678_v3 = vld [vmem:[#allocation2 + $0x24] sm:$0xff]   ;;  %v681_v16 = vld [vmem:[#allocation2 + $0x3c] sm:$0xff]  }
  0x44   : > { %624 = vmatpush3.bf16.msra.mxu1 %v678_v3 }
  0x45   : > { %202 = vperm.xlu1 %670, %v179_v17   ;;  %187 = vperm.xlu0 %669, %v179_v17  }
  0x46   : > { %625 = vmatprep.subr.bf16.mxu1 %v739_v21 }
  0x48   : > { %626 = vmatpush3.bf16.msra.mxu1 %v679_v4 }
  0x49   : > { %206 = vperm.xlu1 %670, %v180_v18   ;;  %192 = vperm.xlu0 %669, %v180_v18  }
  0x4a   : > { %627 = vmatprep.subr.bf16.mxu1 %v739_v21 }
  0x4c   : > { %628 = vmatpush3.bf16.msra.mxu1 %v680_v5 }
  0x4d   : > { %672 = vset.pattern.permute.xlu1 %v738_v19  ;;  %671 = vset.pattern.permute.xlu0 %v738_v19 }
  0x4e   : > { %222 = vperm.xlu1 %672, %v180_v18   ;;  %218 = vperm.xlu0 %671, %v179_v17  }
  0x52   : > { %673 = vset.pattern.permute.xlu1 %v740_v22  ;;  %674 = vset.pattern.permute.xlu0 %v740_v22 }
  0x53   : > { %234 = vperm.xlu1 %673, %v179_v17   ;;  %238 = vperm.xlu0 %674, %v180_v18   ;;  %v682_v17 = vld [vmem:[#allocation2 + $0x34] sm:$0xff]   ;;  %v337_v18 = vrot.slane %v811_v47, %v227_v33 }
  0xc0   : > { %v203_v28 = vpop.permute.xlu1 %202  ;;  %v188_v29 = vpop.permute.xlu0 %187 }
  0xc1   : > { %v213_v41 = vmul.f32 %v212_v36, %v203_v28  ;;  %v199_v42 = vmul.f32 %v198_v37, %v188_v29 }
  0xc3   : > { %v215_v51 = vadd.f32 %v213_v41, %v199_v42 }
  0xc4   : > { %v207_v34 = vpop.permute.xlu1 %206  ;;  %v193_v35 = vpop.permute.xlu0 %192 }
  0xc5   : > { %v214_v43 = vmul.f32 %v212_v36, %v207_v34  ;;  %v200_v44 = vmul.f32 %v198_v37, %v193_v35 }
  0xc7   : > { %v216_v52 = vadd.f32 %v214_v43, %v200_v44 }
  0xc9   : > { %v223_v45 = vpop.permute.xlu1 %222  ;;  %v219_v46 = vpop.permute.xlu0 %218 }
  0xca   : > { %v230_v48 = vmul.f32 %v228_v38, %v223_v45  ;;  %v229_v49 = vmul.f32 %v228_v38, %v219_v46 }
  0xcc   : > { %v232_v56 = vadd.f32 %v230_v48, %v216_v52  ;;  %v231_v57 = vadd.f32 %v229_v49, %v215_v51 }
  0xce   : > { %v235_v54 = vpop.permute.xlu1 %234  ;;  %v239_v55 = vpop.permute.xlu0 %238 }
  0xcf   : > { %v245_v58 = vmul.f32 %v244_v50, %v235_v54  ;;  %v246_v59 = vmul.f32 %v244_v50, %v239_v55 }
  0xd1   : > { %v247_v60 = vadd.f32 %v245_v58, %v231_v57  ;;  %v248_v61 = vadd.f32 %v246_v59, %v232_v56  ;;  %v441_v57 = vrot.slane %v811_v47, %v243_v40 }
  0xd3   : > { %v253_v62 = vadd.f32 %v252_v53, %v247_v60  ;;  %v254_v63 = vadd.f32 %v252_v53, %v248_v61 }
  0xd5   : > { %v255_v0 = vmax.f32 %v253_v62, 0.0  ;;  %v256_v1 = vmax.f32 %v254_v63, 0.0 }
  0xd7   : > { %v257_v2 = vpack.c.bf16 %v256_v1, %v255_v0  ;;  %v504_v0 = vand.u32 127, %v195_v25 }
  0xd9   : > { %618 = vmatmul.mubr.msk.bf16.vlgmr.msra.gmra.mxu0 %vm278_vm2, %v257_v2  ;;  %vm505_vm4 = vcmp.lt.s32.totalorder %v504_v0, 2 }
  0xda   : > { %637 = vmatprep.mubr.msk.bf16.mxu0 %vm741_vm1, %v739_v21  ;;  %634 = vmatpush3.bf16.msra.mxu0 %v681_v16 }
  0xdb   : > { %635 = vmatprep.subr.bf16.mxu0 %v739_v21 }
  0xde   : > { %636 = vmatpush3.bf16.msra.mxu0 %v682_v17 }
 0x199   : > { %v316_v7 = vpop.f32.mrf.mxu0 }
 0x19a   : > { %v317_v9 = vadd.f32 %v316_v7, %v265_v6 }
 0x19b   : > { %v619_v8 = vpop.f32.mrf.mxu0 }
 0x19c   : > { %v323_v13 = vmax.f32 %v317_v9, 0.0 }
 0x19d   : > { %v319_v10 = vpop.f32.mrf.mxu0 }
 0x19e   : > { %v320_v11 = vadd.f32 %v319_v10, %v265_v6 }
 0x19f   : > { %v620_v12 = vpop.f32.mrf.mxu0 }
 0x1a0   : > { %v324_v14 = vmax.f32 %v320_v11, 0.0 }
 0x1a2   : > { %v325_v15 = vpack.c.bf16 %v324_v14, %v323_v13 }
 0x1a4   : > { %630 = vmatmul.mubr.msk.bf16.vlgmr.msra.gmra.mxu1 %vm362_vm3, %v325_v15 }
 0x264   : > { %v400_v19 = vpop.f32.mrf.mxu1 }
 0x265   : > { %v401_v22 = vadd.f32 %v400_v19, %v337_v18 }
 0x266   : > { %v631_v20 = vpop.f32.mrf.mxu1 }
 0x267   : > { %v431_v28 = vmax.f32 %v401_v22, 0.0 }
 0x268   : > { %v403_v23 = vpop.f32.mrf.mxu1 }
 0x269   : > { %v404_v24 = vadd.f32 %v403_v23, %v337_v18 }
 0x26a   : > { %v632_v27 = vpop.f32.mrf.mxu1 }
 0x26b   : > { %v407_v29 = vmax.f32 %v401_v22, %v404_v24  ;;  %v432_v30 = vmax.f32 %v404_v24, 0.0 }
 0x26d   : > { %v408_v31 = vrot.slane %v407_v29, 4  ;;  %v433_v32 = vpack.c.bf16 %v432_v30, %v431_v28 }
 0x26f   : > { %v409_v34 = vmax.f32 %v407_v29, %v408_v31  ;;  %443 = vrot.lane.b32.xlu1 %v433_v32, %s742_s25 }
 0x271   : > { %v410_v35 = vrot.slane %v409_v34, 2 }
 0x273   : > { %v411_v36 = vmax.f32 %v409_v34, %v410_v35 }
 0x275   : > { %v412_v21 = vrot.slane %v411_v36, 1 }
 0x277   : > { %v413_v37 = vmax.f32 %v411_v36, %v412_v21 }
 0x279   : > { %v414_v38 = vsub.f32 %v401_v22, %v413_v37  ;;  %v415_v33 = vsub.f32 %v404_v24, %v413_v37 }
 0x27b   : > { %v416_v39 = vmul.f32 1.442695, %v414_v38  ;;  %v418_v41 = vmul.f32 1.442695, %v415_v33 }
 0x27d   : > { %685 = vpow2.f32 %v416_v39 }
 0x27e   : > { %687 = vpow2.f32 %v418_v41 }
 0x28a   : > { %v686_v42 = vpop.eup %685 }
 0x28b   : > { %v688_v43 = vpop.eup %687 }
 0x28c   : > { %v420_v44 = vadd.f32 %v688_v43, %v686_v42 }
 0x28e   : > { %v421_v45 = vrot.slane %v420_v44, 4 }
 0x290   : > { %v422_v46 = vadd.f32 %v421_v45, %v420_v44 }
 0x292   : > { %v423_v48 = vrot.slane %v422_v46, 2 }
 0x294   : > { %v424_v49 = vadd.f32 %v423_v48, %v422_v46 }
 0x296   : > { %v425_v50 = vrot.slane %v424_v49, 1 }
 0x298   : > { %v426_v51 = vadd.f32 %v425_v50, %v424_v49 }
 0x29a   : > { %689 = vlog2.f32 %v426_v51 }
 0x2a7   : > { %v690_v52 = vpop.eup %689 }
 0x2a8   : > { %v428_v53 = vmul.f32 0.6931472, %v690_v52 }
 0x2aa   : > { %v429_v54 = vsub.f32 %v414_v38, %v428_v53  ;;  %v430_v55 = vsub.f32 %v415_v33, %v428_v53 }
 0x2e1   : > { %v444_v56 = vpop.permute.xlu1 %443 }
 0x2e2   : > { %638 = vmatmul.mubr.msk.bf16.vlgmr.msra.gmra.mxu0 %vm278_vm2, %v444_v56 }
 0x3a2   : > { %v494_v58 = vpop.f32.mrf.mxu0 }
 0x3a3   : > { %v495_v59 = vadd.f32 %v494_v58, %v441_v57 }
 0x3a4   : > { %v639_v60 = vpop.f32.mrf.mxu0 }
 0x3a5   : > { %691 = vtanh.f32 %v495_v59 }
 0x3a6   : > { %v497_v61 = vpop.f32.mrf.mxu0 }
 0x3a7   : > { %v498_v62 = vadd.f32 %v497_v61, %v441_v57 }
 0x3a8   : > { %v640_v63 = vpop.f32.mrf.mxu0 }
 0x3a9   : > { %693 = vtanh.f32 %v498_v62 }
 0x3b2   : > { %v692_v1 = vpop.eup %691 }
 0x3b3   : > { %v506_v26 = vsel %vm505_vm4, %v429_v54, %v692_v1 }
 0x3b4   : > { %508 = vst [vmem:[%s160_s28] sm:$0xff] %v506_v26 }
 0x3b6   : > { %v694_v40 = vpop.eup %693 }
 0x3b7   : > { %v507_v47 = vsel %vm505_vm4, %v430_v55, %v694_v40 }
 0x3b8   : > { %509 = vst [vmem:[%s160_s28 + $0x8] sm:$0xff] %v507_v47 }
 0x3b9 PF: > { %s13_s9 = sadd.s32 1, %s731_s9  }
 0x3ba   : > { %p10_p1 = scmp.ge.s32.totalorder %s13_s9, 6  }
 0x3bc   :  { %12 = sbr.rel (!%p10_p1) target bundleno = 1 (0x1), region = 63 }
 0x3c1   :  { %532 = vsyncpa [#allocation3], 1 }
 0x3c2   :  { %534 = vsyncpa [#allocation3 + $0x1], 1 }

</bundles_post_ra>
